<compile_context>
chip_gen: v5e
topology: v5e:2x2
jax: 0.10.0
libtpu: 0.0.40
codegen_flags: <defaults>
</compile_context>

<pallas_src>
import functools

import numpy as np
import jax
import jax.numpy as jnp
from jax.experimental import pallas as pl
from jax.experimental.pallas import tpu as pltpu

NUM_ITEMS = 100  # constructor argument `num_items`; sampled ids lie in [1, NUM_ITEMS-1]


def _round_up(x: int, m: int) -> int:
    return ((x + m - 1) // m) * m


def _neg_sample_kernel(seed_ref, neg_items_ref, *, span: int):
    """Fill one (rows, cols) block with uniform ids in [1, span]."""
    rows, cols = neg_items_ref.shape
    blk = pl.program_id(0)

    # Unique 32-bit counter per output element across the whole grid.
    row_ids = jax.lax.broadcasted_iota(jnp.int32, (rows, cols), 0)
    col_ids = jax.lax.broadcasted_iota(jnp.int32, (rows, cols), 1)
    ctr = ((blk * rows + row_ids) * cols + col_ids).astype(jnp.uint32)

    # splitmix32-style finalizer of (counter ^ seed*golden): pure VPU int ops,
    # wraps mod 2^32; uint32 so >> is a logical shift.
    seed = seed_ref[0].astype(jnp.uint32) * jnp.uint32(0x9E3779B9)
    x = ctr ^ seed
    x = x ^ (x >> 16)
    x = x * jnp.uint32(0x7FEB352D)
    x = x ^ (x >> 15)
    x = x * jnp.uint32(0x846CA68B)
    x = x ^ (x >> 16)

    # Shift-multiply range reduction (no modulo): random bits -> [0, span) -> [1, span].
    if span < 256:
        bits = (x >> 8) & jnp.uint32(0x00FFFFFF)          # 24 random bits
        idx = (bits * jnp.uint32(span)) >> 24
    else:
        bits = x >> 16                                     # 16 random bits
        idx = (bits * jnp.uint32(span)) >> 16
    neg_items_ref[...] = idx.astype(jnp.int32) + 1


def uniform_sampler_forward(query, num_neg, seed, pos_items=None, num_items=NUM_ITEMS):
    """JAX/Pallas equivalent of UniformSampler.forward."""
    shape = tuple(query.shape[:-1])
    num_queries = int(np.prod(shape)) if shape else 1
    span = num_items - 1                                   # ids in [1, num_items-1]

    # Lane-dense padding: last dim multiple of 128, rows multiple of 8.
    padded_neg = _round_up(max(int(num_neg), 1), 128)
    # Keep one (double-buffered) int32 block around ~2 MiB so it fits v7x VMEM.
    max_rows_for_vmem = max(8, ((2 * 1024 * 1024) // (4 * padded_neg)) // 8 * 8)
    row_block = min(1024, _round_up(num_queries, 8), max_rows_for_vmem)
    padded_rows = _round_up(num_queries, row_block)
    grid = (padded_rows // row_block,)

    seed_arr = jnp.asarray([seed], dtype=jnp.int32)

    neg_items_flat = pl.pallas_call(
        functools.partial(_neg_sample_kernel, span=span),
        out_shape=jax.ShapeDtypeStruct((padded_rows, padded_neg), jnp.int32),
        grid=grid,
        in_specs=[pl.BlockSpec(memory_space=pltpu.MemorySpace.SMEM)],
        out_specs=pl.BlockSpec((row_block, padded_neg), lambda i: (i, 0)),
        compiler_params=pltpu.CompilerParams(dimension_semantics=("parallel",)),
    )(seed_arr)

    neg_items = neg_items_flat[:num_queries, :num_neg].reshape(*shape, num_neg)
    # compute_item_p == ones; materialized by XLA in the wrapper, not in Pallas.
    neg_prob = jnp.ones(neg_items.shape, dtype=jnp.float32)
    if pos_items is not None:
        pos_prob = jnp.ones(pos_items.shape, dtype=jnp.float32)
        return pos_prob, neg_items, neg_prob
    return neg_items, neg_prob


if __name__ == "__main__":
    key = jax.random.PRNGKey(0)
    kq, kp = jax.random.split(key, 2)

    B, L, D = 2, 8, 32        # query: (batch, seq, hidden)
    NUM_NEG = 128             # lane-dense negative count

    query = jax.random.normal(kq, (B, L, D), dtype=jnp.float32)
    pos_items = jax.random.randint(kp, (B, L), 1, NUM_ITEMS, dtype=jnp.int32)
    seed = 1234

    pos_prob, neg_items, neg_prob = uniform_sampler_forward(
        query, NUM_NEG, seed, pos_items=pos_items)
    jax.block_until_ready((pos_prob, neg_items, neg_prob))

    # sanity checks against the reference semantics
    assert neg_items.shape == (B, L, NUM_NEG) and neg_items.dtype == jnp.int32
    assert neg_prob.shape == (B, L, NUM_NEG) and neg_prob.dtype == jnp.float32
    assert pos_prob.shape == (B, L) and pos_prob.dtype == jnp.float32
    assert bool(jnp.all(neg_items >= 1)) and bool(jnp.all(neg_items <= NUM_ITEMS - 1))
    assert bool(jnp.all(neg_prob == 1.0)) and bool(jnp.all(pos_prob == 1.0))
    assert int(jnp.unique(neg_items).size) > 1   # ids are actually varying

    # path without pos_items
    neg_items2, neg_prob2 = uniform_sampler_forward(query, NUM_NEG, seed)
    jax.block_until_ready((neg_items2, neg_prob2))
    assert neg_items2.shape == (B, L, NUM_NEG) and neg_prob2.shape == (B, L, NUM_NEG)

    print("KERNEL_OK")
</pallas_src>

<mosaic_0001>
module attributes {stable_mosaic.version = 11 : i64} {
  func.func @_neg_sample_kernel(%arg0: i32, %arg1: memref<1xi32, #tpu.memory_space<smem>>, %arg2: memref<16x128xi32, #tpu.memory_space<vmem>>) attributes {dimension_semantics = [#tpu.dimension_semantics<parallel>], iteration_bounds = array<i64: 1>, scalar_prefetch = 0 : i64, scratch_operands = 0 : i64, tpu.core_type = #tpu.core_type<tc>, window_params = [{transform_indices = @transform_0, window_bounds = array<i64: 1>}, {transform_indices = @transform_1, window_bounds = array<i64: 16, 128>}]} {
    %0 = tpu.iota {dimensions = array<i32: 0>} : vector<16x128xi32>
    %1 = tpu.iota {dimensions = array<i32: 1>} : vector<16x128xi32>
    %c16_i32 = arith.constant 16 : i32
    %2 = arith.muli %arg0, %c16_i32 : i32
    %3 = vector.broadcast %2 : i32 to vector<16x128xi32>
    %4 = arith.addi %3, %0 : vector<16x128xi32>
    %c128_i32 = arith.constant 128 : i32
    %5 = vector.broadcast %c128_i32 : i32 to vector<16x128xi32>
    %6 = arith.muli %4, %5 : vector<16x128xi32>
    %7 = arith.addi %6, %1 : vector<16x128xi32>
    %c0 = arith.constant 0 : index
    %8 = memref.load %arg1[%c0] : memref<1xi32, #tpu.memory_space<smem>>
    %c-1640531527_i32 = arith.constant -1640531527 : i32
    %9 = arith.muli %8, %c-1640531527_i32 : i32
    %10 = vector.broadcast %9 : i32 to vector<16x128xi32>
    %11 = arith.xori %7, %10 : vector<16x128xi32>
    %c16_i32_0 = arith.constant 16 : i32
    %12 = vector.broadcast %c16_i32_0 : i32 to vector<16x128xi32>
    %13 = arith.shrui %11, %12 : vector<16x128xi32>
    %14 = arith.xori %11, %13 : vector<16x128xi32>
    %c2146121005_i32 = arith.constant 2146121005 : i32
    %15 = vector.broadcast %c2146121005_i32 : i32 to vector<16x128xi32>
    %16 = arith.muli %14, %15 : vector<16x128xi32>
    %c15_i32 = arith.constant 15 : i32
    %17 = vector.broadcast %c15_i32 : i32 to vector<16x128xi32>
    %18 = arith.shrui %16, %17 : vector<16x128xi32>
    %19 = arith.xori %16, %18 : vector<16x128xi32>
    %c-2073254261_i32 = arith.constant -2073254261 : i32
    %20 = vector.broadcast %c-2073254261_i32 : i32 to vector<16x128xi32>
    %21 = arith.muli %19, %20 : vector<16x128xi32>
    %c16_i32_1 = arith.constant 16 : i32
    %22 = vector.broadcast %c16_i32_1 : i32 to vector<16x128xi32>
    %23 = arith.shrui %21, %22 : vector<16x128xi32>
    %24 = arith.xori %21, %23 : vector<16x128xi32>
    %c8_i32 = arith.constant 8 : i32
    %25 = vector.broadcast %c8_i32 : i32 to vector<16x128xi32>
    %26 = arith.shrui %24, %25 : vector<16x128xi32>
    %c16777215_i32 = arith.constant 16777215 : i32
    %27 = vector.broadcast %c16777215_i32 : i32 to vector<16x128xi32>
    %28 = arith.andi %26, %27 : vector<16x128xi32>
    %c99_i32 = arith.constant 99 : i32
    %29 = vector.broadcast %c99_i32 : i32 to vector<16x128xi32>
    %30 = arith.muli %28, %29 : vector<16x128xi32>
    %c24_i32 = arith.constant 24 : i32
    %31 = vector.broadcast %c24_i32 : i32 to vector<16x128xi32>
    %32 = arith.shrui %30, %31 : vector<16x128xi32>
    %c1_i32 = arith.constant 1 : i32
    %33 = vector.broadcast %c1_i32 : i32 to vector<16x128xi32>
    %34 = arith.addi %32, %33 : vector<16x128xi32>
    %c0_2 = arith.constant 0 : index
    %c0_3 = arith.constant 0 : index
    %35 = vector.load %arg2[%c0_2, %c0_3] : memref<16x128xi32, #tpu.memory_space<vmem>>, vector<16x128xi32>
    tpu.vector_store %arg2[%c0_2, %c0_3], %34 {strides = array<i32>} : memref<16x128xi32, #tpu.memory_space<vmem>>, vector<16x128xi32>,
    return
  }
  func.func @transform_0(%arg0: i32) -> i32 {
    %c0_i32 = arith.constant 0 : i32
    %c0_i32_0 = arith.constant 0 : i32
    return %c0_i32 : i32
  }
  func.func @transform_1(%arg0: i32) -> (i32, i32) {
    %c0_i32 = arith.constant 0 : i32
    %c0_i32_0 = arith.constant 0 : i32
    return %arg0, %c0_i32 : i32, i32
  }
}

</mosaic_0001>

<bundles_post_ra>
// kernel: tpu_custom_call.1
= control target key start
LH: loop header
LB: loop body
LE: loop exit
PB: predicated region body
PF: predicated region fallthrough
CT: control target
= control target key end

     0   :  { %v10_v0 = vlaneseq  ;;  %s124_s0 = inlined_call_operand.<no memory space> [shape: s32[1], index: 0, kind: input, shape index: {}]   ;;  %s125_s1 = inlined_call_operand.hbm [shape: s32[16,128], index: 1, kind: output, shape index: {}]  }
   0x1   :  { %7 = vsyncpa [#allocation4], 0  ;;  %s24_s8 = smul.u32 2654435769, %s124_s0  ;;  %s105_s0 = smov [#allocation3]  }
   0x2   :  { %v11_v1 = vshrl.u32 %v10_v0, 7  ;;  %v14_v2 = vand.u32 127, %v10_v0  ;;  %s60_s9 = sshll.u32 %s105_s0, 4  ;;  %s62_s12 = sshll.u32 %s125_s1, 4  ;;  %s61_s9 = int_to_ptr.vmem [resolvable:$true] %s60_s9  ;;  %s63_s12 = int_to_ptr.hbm [resolvable:$true] %s62_s12 }
   0x3   :  { %v25_v5 = vstv %s24_s8  ;;  %s106_s13 = smov 128   ;;  %s107_s14 = smov 8  }
   0x4   :  { %v19_v3 = vmul.u32 128, %v11_v1  ;;  %v12_v4 = vadd.s32 8, %v11_v1 }
   0x6   :  { %v21_v6 = vadd.s32 %v19_v3, %v14_v2  ;;  %v20_v7 = vmul.u32 128, %v12_v4 }
   0x8   :  { %v26_v8 = vxor.u32 %v25_v5, %v21_v6  ;;  %v22_v9 = vadd.s32 %v20_v7, %v14_v2 }
   0xa   :  { %v28_v10 = vshrl.u32 %v26_v8, 16  ;;  %v27_v11 = vxor.u32 %v25_v5, %v22_v9 }
   0xc   :  { %v30_v12 = vxor.u32 %v28_v10, %v26_v8  ;;  %v29_v13 = vshrl.u32 %v27_v11, 16 }
   0xe   :  { %v32_v14 = vmul.u32 2146121005, %v30_v12  ;;  %v31_v15 = vxor.u32 %v29_v13, %v27_v11 }
  0x10   :  { %v34_v16 = vshrl.u32 %v32_v14, 15  ;;  %v33_v17 = vmul.u32 2146121005, %v31_v15 }
  0x12   :  { %v36_v18 = vxor.u32 %v34_v16, %v32_v14  ;;  %v35_v19 = vshrl.u32 %v33_v17, 15 }
  0x14   :  { %v38_v20 = vmul.u32 2221713035, %v36_v18  ;;  %v37_v21 = vxor.u32 %v35_v19, %v33_v17 }
  0x16   :  { %v40_v22 = vshrl.u32 %v38_v20, 16  ;;  %v39_v23 = vmul.u32 2221713035, %v37_v21 }
  0x18   :  { %v42_v24 = vxor.u32 %v40_v22, %v38_v20  ;;  %v41_v25 = vshrl.u32 %v39_v23, 16 }
  0x1a   :  { %v74_v26 = vshrl.u32 %v42_v24, 8  ;;  %v43_v27 = vxor.u32 %v41_v25, %v39_v23 }
  0x1c   :  { %v48_v28 = vmul.u32 99, %v74_v26  ;;  %v75_v29 = vshrl.u32 %v43_v27, 8 }
  0x1e   :  { %v50_v30 = vshrl.u32 %v48_v28, 24  ;;  %v49_v31 = vmul.u32 99, %v75_v29 }
  0x20   :  { %v52_v32 = vadd.s32 1, %v50_v30  ;;  %v51_v33 = vshrl.u32 %v49_v31, 24 }
  0x22   :  { %54 = vst [vmem:[#allocation3] sm:$0xff] %v52_v32  ;;  %v53_v34 = vadd.s32 1, %v51_v33 }
  0x24   :  { %55 = vst [vmem:[#allocation3 + $0x8] sm:$0xff] %v53_v34 }
  0x25   :  { %68 = dma.vmem_to_hbm [thread:$0]  %s61_s9, 256, %s63_s12, [#allocation4], %s106_s13, %s106_s13, %s107_s14  }
  0x26   :  { %103 = dma.done.wait [#allocation4], 256  }
  0x27   :  { %104 = vsyncadd [#allocation4], 4294967040 }
  0x28   :  { %73 = vsyncpa [#allocation4], 1 }

</bundles_post_ra>
